<compile_context>
chip_gen: v6e
topology: v6e:2x2x1
jax: 0.10.0
libtpu: 0.0.40
codegen_flags: <defaults>
</compile_context>

<pallas_src>
import jax
import jax.numpy as jnp
from jax.experimental import pallas as pl
from jax.experimental.pallas import tpu as pltpu

_TARGET_BLOCK_BYTES = 2 << 20           # ~2 MiB blocks: at/above HBM roofline knee
_VMEM_LIMIT_BYTES = 32 * 1024 * 1024    # explicit; safe on v5e / v6e / v7x


def _add_kernel(x_ref, pe_ref, o_ref):
    """out = x + pe, where pe may carry extra (8-aligned) rows and a size-1
    leading broadcast dim; slice/broadcast are resolved on loaded values."""
    x = x_ref[...]
    pe = pe_ref[...]
    rows = x.shape[-2]
    if pe.shape[-2] != rows:           # pe block was 8-row padded; trim to x rows
        pe = pe[..., :rows, :]
    o_ref[...] = (x + pe).astype(o_ref.dtype)


def _broadcast_add(x3, pe3):
    """x3: (B, R, C); pe3: (1, Rpe, C) with Rpe >= R. Returns x3 + pe3[:, :R]."""
    B, R, C = x3.shape
    Rpe = pe3.shape[1]
    itemsize = jnp.dtype(x3.dtype).itemsize
    row_bytes = C * itemsize
    budget_rows = max(8, (_TARGET_BLOCK_BYTES // row_bytes) // 8 * 8)

    if R >= budget_rows:
        # ---- Case A: tile the row axis; grid (row_tiles, B), b innermost so
        # pe's block index is constant across b (DMA'd once per row tile).
        t_tile = budget_rows
        if B == 1 and R < 2 * t_tile and t_tile > 8:
            # keep >= 2 grid points so both v7x TensorCores get work
            t_tile = max(8, (t_tile // 2) // 8 * 8)
        grid = (pl.cdiv(R, t_tile), B)
        return pl.pallas_call(
            _add_kernel,
            out_shape=jax.ShapeDtypeStruct((B, R, C), x3.dtype),
            grid=grid,
            in_specs=[
                pl.BlockSpec((pl.Squeezed(), t_tile, C), lambda t, b: (b, t, 0)),
                pl.BlockSpec((pl.Squeezed(), t_tile, C), lambda t, b: (0, t, 0)),
            ],
            out_specs=pl.BlockSpec((pl.Squeezed(), t_tile, C), lambda t, b: (b, t, 0)),
            compiler_params=pltpu.CompilerParams(
                dimension_semantics=("parallel", "parallel"),
                vmem_limit_bytes=_VMEM_LIMIT_BYTES,
            ),
        )(x3, pe3)

    # ---- Case B: per-batch slab smaller than the budget -> fold several batch
    # elements into one block; pe broadcasts over the folded batch dim.
    slab_bytes = R * row_bytes
    b_tile = max(1, _TARGET_BLOCK_BYTES // slab_bytes)
    b_tile = min(b_tile, B)
    if B >= 2:
        # keep >= 2 grid points so both v7x TensorCores get work
        b_tile = min(b_tile, pl.cdiv(B, 2))
    # pe block rows must be a multiple of 8 or equal pe's full row extent.
    r8 = pl.cdiv(R, 8) * 8
    pe_rows = Rpe if Rpe < r8 else r8
    grid = (pl.cdiv(B, b_tile),)
    return pl.pallas_call(
        _add_kernel,
        out_shape=jax.ShapeDtypeStruct((B, R, C), x3.dtype),
        grid=grid,
        in_specs=[
            pl.BlockSpec((b_tile, R, C), lambda b: (b, 0, 0)),
            pl.BlockSpec((1, pe_rows, C), lambda b: (0, 0, 0)),
        ],
        out_specs=pl.BlockSpec((b_tile, R, C), lambda b: (b, 0, 0)),
        compiler_params=pltpu.CompilerParams(
            dimension_semantics=("parallel",),
            vmem_limit_bytes=_VMEM_LIMIT_BYTES,
        ),
    )(x3, pe3)


def simple_positional_encoding(x, pe):
    """forward(x) = x + pe[:, :x.shape[1]].  x: (B, T, D); pe: (1, max_len, D)."""
    B, T, D = x.shape
    max_len = pe.shape[1]
    if D % 128 != 0 and (T * D) % 128 == 0 and (max_len * D) % 128 == 0:
        # Lane-dense flat path: fold (T, D) onto (rows, 128).  Row-major order
        # means the first T*D elements of pe are exactly pe[:, :T, :], so the
        # window is pure BlockSpec indexing -- no pe copy in HBM.
        x3 = x.reshape(B, (T * D) // 128, 128)
        pe3 = pe.reshape(1, (max_len * D) // 128, 128)
        out = _broadcast_add(x3, pe3)
        return out.reshape(B, T, D)
    # General path: D stays on lanes (full-D blocks are legal for any D; masked
    # stores only when D % 128 != 0 and the flat path is not applicable).
    return _broadcast_add(x, pe)


if __name__ == "__main__":
    key = jax.random.PRNGKey(0)
    k1, k2, k3, k4, k5, k6 = jax.random.split(key, 6)

    # Case 1: module-scale shapes (d_model=32 < 128 -> lane-dense flat path).
    B, T, D, max_len = 2, 8, 32, 16
    x = jax.random.normal(k1, (B, T, D), dtype=jnp.float32)
    pe = 0.02 * jax.random.normal(k2, (1, max_len, D), dtype=jnp.float32)
    out = simple_positional_encoding(x, pe)
    jax.block_until_ready(out)
    ref = x + pe[:, :T]
    assert out.shape == (B, T, D)
    assert jnp.allclose(out, ref, atol=1e-6), "flat path mismatch vs reference"

    # Case 2: D multiple of 128 -> 3-D path with batch folding.
    B2, T2, D2, max_len2 = 2, 16, 128, 32
    x2 = jax.random.normal(k3, (B2, T2, D2), dtype=jnp.float32)
    pe2 = 0.02 * jax.random.normal(k4, (1, max_len2, D2), dtype=jnp.float32)
    out2 = simple_positional_encoding(x2, pe2)
    jax.block_until_ready(out2)
    ref2 = x2 + pe2[:, :T2]
    assert out2.shape == (B2, T2, D2)
    assert jnp.allclose(out2, ref2, atol=1e-6), "3-D path mismatch vs reference"

    # Case 3: ragged T with D % 128 != 0 and no flat folding -> general path,
    # exercises the 8-row-padded pe block sliced inside the kernel.
    B3, T3, D3, max_len3 = 2, 7, 32, 16
    x3 = jax.random.normal(k5, (B3, T3, D3), dtype=jnp.float32)
    pe3 = 0.02 * jax.random.normal(k6, (1, max_len3, D3), dtype=jnp.float32)
    out3 = simple_positional_encoding(x3, pe3)
    jax.block_until_ready(out3)
    ref3 = x3 + pe3[:, :T3]
    assert out3.shape == (B3, T3, D3)
    assert jnp.allclose(out3, ref3, atol=1e-6), "ragged path mismatch vs reference"

    print("KERNEL_OK")
</pallas_src>

<mosaic_0001>
module attributes {stable_mosaic.version = 11 : i64} {
  func.func @_add_kernel(%arg0: i32, %arg1: memref<1x2x128xf32, #tpu.memory_space<vmem>>, %arg2: memref<1x4x128xf32, #tpu.memory_space<vmem>>, %arg3: memref<1x2x128xf32, #tpu.memory_space<vmem>>) attributes {dimension_semantics = [#tpu.dimension_semantics<parallel>], iteration_bounds = array<i64: 2>, scalar_prefetch = 0 : i64, scratch_operands = 0 : i64, tpu.core_type = #tpu.core_type<tc>, window_params = [{transform_indices = @transform_0, window_bounds = array<i64: 1, 2, 128>}, {pipeline_mode = #tpu.pipeline_mode<synchronous>, transform_indices = @transform_1, window_bounds = array<i64: 1, 4, 128>}, {transform_indices = @transform_2, window_bounds = array<i64: 1, 2, 128>}]} {
    %c0 = arith.constant 0 : index
    %c0_0 = arith.constant 0 : index
    %c0_1 = arith.constant 0 : index
    %0 = vector.load %arg1[%c0, %c0_0, %c0_1] : memref<1x2x128xf32, #tpu.memory_space<vmem>>, vector<1x2x128xf32>
    %c0_2 = arith.constant 0 : index
    %c0_3 = arith.constant 0 : index
    %c0_4 = arith.constant 0 : index
    %1 = vector.load %arg2[%c0_2, %c0_3, %c0_4] : memref<1x4x128xf32, #tpu.memory_space<vmem>>, vector<1x4x128xf32>
    %2 = vector.extract_strided_slice %1 {offsets = [0, 0, 0], sizes = [1, 2, 128], strides = [1, 1, 1]} : vector<1x4x128xf32> to vector<1x2x128xf32>
    %3 = arith.addf %0, %2 : vector<1x2x128xf32>
    %c0_5 = arith.constant 0 : index
    %c0_6 = arith.constant 0 : index
    %c0_7 = arith.constant 0 : index
    %4 = vector.load %arg3[%c0_5, %c0_6, %c0_7] : memref<1x2x128xf32, #tpu.memory_space<vmem>>, vector<1x2x128xf32>
    tpu.vector_store %arg3[%c0_5, %c0_6, %c0_7], %3 {strides = array<i32>} : memref<1x2x128xf32, #tpu.memory_space<vmem>>, vector<1x2x128xf32>,
    return
  }
  func.func @transform_0(%arg0: i32) -> (i32, i32, i32) {
    %c0_i32 = arith.constant 0 : i32
    %c0_i32_0 = arith.constant 0 : i32
    %c0_i32_1 = arith.constant 0 : i32
    return %arg0, %c0_i32, %c0_i32_0 : i32, i32, i32
  }
  func.func @transform_1(%arg0: i32) -> (i32, i32, i32) {
    %c0_i32 = arith.constant 0 : i32
    %c0_i32_0 = arith.constant 0 : i32
    %c0_i32_1 = arith.constant 0 : i32
    %c0_i32_2 = arith.constant 0 : i32
    return %c0_i32, %c0_i32_0, %c0_i32_1 : i32, i32, i32
  }
  func.func @transform_2(%arg0: i32) -> (i32, i32, i32) {
    %c0_i32 = arith.constant 0 : i32
    %c0_i32_0 = arith.constant 0 : i32
    %c0_i32_1 = arith.constant 0 : i32
    return %arg0, %c0_i32, %c0_i32_0 : i32, i32, i32
  }
}

</mosaic_0001>

<bundles_post_ra>
// kernel: tpu_custom_call.1
= control target key start
LH: loop header
LB: loop body
LE: loop exit
PB: predicated region body
PF: predicated region fallthrough
CT: control target
= control target key end

     0   :  { %7 = vsyncpa [#allocation3], 0  ;;  %s649_s0 = inlined_call_operand.hbm [shape: f32[2,2,128], index: 0, kind: input, shape index: {}]   ;;  %s650_s1 = inlined_call_operand.hbm [shape: f32[1,4,128], index: 1, kind: input, shape index: {}]   ;;  %s651_s2 = inlined_call_operand.hbm [shape: f32[2,2,128], index: 2, kind: output, shape index: {}]  }
   0x1   :  { %9 = vsyncpa [#allocation3 + $0x1], 0 }
   0x2   :  { %10 = vsyncpa [#allocation6], 0 }
   0x3   :  { %11 = vsyncpa [#allocation4], 0 }
   0x4   :  { %13 = vsyncpa [#allocation4 + $0x1], 0  ;;  %s483_s9 = smov 0   ;;  %s485_s10 = smov 0  }
   0x5   :  { %s487_s11 = smov 0   ;;  %s489_s12 = smov 0  }
   0x6 LB: > { %s504_s13 = sadd.s32 4294967295, %s463_s12   ;;  %s270_s14 = sadd.s32 4294967294, %s463_s12   ;;  %s463_s12 = sphi %s489_s12, %s674_s12   ;;  %s459_s11 = sphi %s487_s11, %s673_s11   ;;  %s455_s10 = sphi %s485_s10, %s672_s10   ;;  %s451_s9 = sphi %s483_s9, %s671_s9  }
   0x7   : > { %p39_p0 = scmp.ne.s32.totalorder %s455_s10, %s451_s9  ;;  %p652_p1 = scmp.eq.s32.totalorder %s504_s13, 0 }
   0x8   : > { %p90_p3 = scmp.eq.s32.totalorder %s270_s14, 1  ;;  %p271_p5 = scmp.ge.s32.totalorder %s463_s12, 1 }
   0x9   : > { %p513_p4 = por %p652_p1, %p39_p0  ;;  %p97_p7 = scmp.lt.s32.totalorder %s463_s12, 3 }
   0xa   : > { %p518_p6 = por %p90_p3, %p39_p0  ;;  %s465_s18 = smov [#allocation5]  }
   0xb   : > { %s656_s15 = scalar_select %p513_p4, 1, 0 }
   0xc   : > { %s657_s16 = scalar_select %p518_p6, 1, 0 }
   0xd   : > { %p523_p8 = pnand %p271_p5, %p97_p7  ;;  %s110_s19 = sshll.u32 %s465_s18, 4  ;;  %s111_s19 = int_to_ptr.vmem [resolvable:$true] %s110_s19 }
   0xe   : > { %s531_s20 = sadd.s32 1, %s463_s12   ;;  %s26_s24 = sadd.s32 1, %s459_s11 }
   0xf   : > { %s658_s17 = scalar_select %p523_p8, 1, 0 }
  0x10   : > { %p292_p10 = pneg %p523_p8  ;;  %s23_s22 = ssub.s32 %s463_s12, %s531_s20 }
  0x11   : > { %p541_p12 = scmp.eq.s32.totalorder %s23_s22, 0  ;;  %p33_p13 = scmp.ne.s32.totalorder %s459_s11, %s455_s10 }
  0x12   : > { %p535_p11 = pnand %p292_p10, %p652_p1  ;;  %s352_s25 = scalar_lea.vmem %s111_s19, 64 }
  0x13   : > { %p353_p3 = scmp.ne.s32.totalorder %s111_s19, %s352_s25  ;;  %p360_p9 = scmp.lt.s32.totalorder %s111_s19, %s111_s19 }
  0x14   : > { %p343_p0 = pneg %p535_p11  ;;  %p361_p2 = scmp.lt.s32.totalorder %s352_s25, %s352_s25 }
  0x16   : > { %p355_p5 = pnand %p353_p3, %p343_p0  ;;  %p362_p10 = por %p361_p2, %p360_p9 }
  0x18   : > { %p356_p7 = pneg %p355_p5 }
  0x1a   : > { %p363_p1 = pnand %p362_p10, %p356_p7 }
  0x1c   : > { %366 = shalt.err (!%p363_p1)
}
  0x1d   : > { %295 = dma.hbm_to_vmem [thread:$0]  (!%p535_p11), %s650_s1, 64, %s111_s19, [#allocation6]  }
  0x1e   : > { %s558_s28 = scalar_select %p541_p12, %s459_s11, %s26_s24  }
  0x1f   : > { %p34_p1 = scmp.eq.s32.totalorder %s463_s12, 0  ;;  %p661_p2 = scmp.eq.s32.totalorder %s504_s13, 1 }
  0x20   : > { %p305_p0 = scmp.lt.s32.totalorder %s463_s12, 2  ;;  %s121_s30 = sand.u32 1, %s459_s11  }
  0x21   : > { %p566_p9 = por %p661_p2, %p33_p13  ;;  %p35_p3 = por %p34_p1, %p33_p13 }
  0x22   : > { %s274_s3 = sshll.u32 %s121_s30, 1  ;;  %s275_s4 = sshll.u32 %s463_s12, 5 }
  0x23   : > { %s662_s29 = scalar_select %p566_p9, 1, 0 }
  0x24   : > { %s579_s7 = scalar_lea.hbm %s649_s0, %s275_s4  ;;  %s125_s8 = scalar_lea.vmem [#allocation2], %s274_s3 }
  0x25   : > { %s132_s14 = sshll.u32 %s125_s8, 4  ;;  %p581_p11 = pnand %p305_p0, %p35_p3  ;;  %s133_s14 = int_to_ptr.vmem [resolvable:$true] %s132_s14 }
  0x26   : > { %s122_s19 = scalar_lea.sflag [#allocation3], %s121_s30  ;;  %s367_s21 = scalar_lea.hbm %s579_s7, 32 }
  0x27   : > { %p368_p12 = scmp.ne.s32.totalorder %s579_s7, %s367_s21  ;;  %p369_p13 = pneg %p581_p11 }
  0x28   : > { %s372_s24 = scalar_lea.hbm %s649_s0, 64  ;;  %p373_p10 = scmp.lt.s32.totalorder %s579_s7, %s649_s0 }
  0x29   : > { %p370_p5 = pnand %p369_p13, %p368_p12  ;;  %p374_p1 = scmp.lt.s32.totalorder %s372_s24, %s367_s21 }
  0x2b   : > { %p371_p7 = pneg %p370_p5  ;;  %p375_p2 = por %p374_p1, %p373_p10 }
  0x2d   : > { %p376_p0 = pnand %p375_p2, %p371_p7 }
  0x2f   : > { %379 = shalt.err (!%p376_p0)
}
  0x30   : > { %s380_s27 = scalar_lea.vmem %s133_s14, 32  ;;  %s466_s30 = smov [#allocation2]  }
  0x31   : > { %p381_p3 = scmp.ne.s32.totalorder %s133_s14, %s380_s27  ;;  %s385_s3 = sshll.u32 %s466_s30, 4  ;;  %s386_s3 = int_to_ptr.vmem [resolvable:$false] %s385_s3 }
  0x32   : > { %s387_s4 = scalar_lea.vmem %s386_s3, 64  ;;  %p388_p12 = scmp.lt.s32.totalorder %s133_s14, %s386_s3 }
  0x33   : > { %p383_p6 = pnand %p381_p3, %p369_p13  ;;  %p389_p5 = scmp.lt.s32.totalorder %s387_s4, %s380_s27 }
  0x35   : > { %p384_p9 = pneg %p383_p6  ;;  %p390_p4 = por %p389_p5, %p388_p12 }
  0x37   : > { %p391_p8 = pnand %p390_p4, %p384_p9 }
  0x39   : > { %394 = shalt.err (!%p391_p8)
}
  0x3a   : > { %299 = dma.hbm_to_vmem [thread:$0]  (!%p581_p11), %s579_s7, 32, %s133_s14, %s122_s19  }
  0x3b   : > { %p664_p7 = scmp.ne.s32.totalorder %s658_s17, 0 }
  0x3c   : > { %s602_s5 = sand.u32 (!%p664_p7), 1, %s455_s10   ;;  %p665_p6 = scmp.ne.s32.totalorder (!%p664_p7), %s656_s15, 0 }
  0x3d   : > { %141 = sbr.rel (%p664_p7) target bundleno = 95 (0x5f), region = 28  ;;  %s277_s6 = sshll.u32 (!%p664_p7), %s602_s5, 1 }
  0x3e   : > { %s144_s8 = scalar_lea.sflag (!%p664_p7), [#allocation3], %s602_s5  ;;  %s147_s21 = scalar_lea.vmem (!%p664_p7), [#allocation2], %s277_s6 }
  0x42   : > { %438 = dma.done.wait (%p665_p6), %s144_s8, 32  }
  0x43   : > { %440 = vsyncadd (%p665_p6), %s144_s8, 4294967264  ;;  %p666_p4 = scmp.eq.s32.totalorder %s504_s13, 0 }
  0x45   : > { %442 = dma.done.wait (%p666_p4), [#allocation6], 64   ;;  %p667_p8 = pmov %p666_p4 }
  0x46   : > { %s171_s17 = scalar_lea.vmem [#allocation7], %s277_s6  ;;  %s281_s14 = sshll.u32 %s504_s13, 5  ;;  %v172_v0 = vld [vmem:[%s147_s21] sm:$0x3]  ;;  %v173_v1 = vld [vmem:[#allocation5] sm:$0xf] }
  0x47   : > { %444 = vsyncadd (%p667_p8), [#allocation6], 4294967232  ;;  %s190_s7 = sshll.u32 %s171_s17, 4  ;;  %v174_v2 = vadd.f32 %v173_v1, %v172_v0  ;;  %s188_s15 = scalar_lea.hbm %s651_s2, %s281_s14  ;;  %s191_s7 = int_to_ptr.vmem [resolvable:$true] %s190_s7 }
  0x48   : > { %s177_s22 = scalar_lea.sflag [#allocation4], %s602_s5  ;;  %s395_s23 = scalar_lea.vmem %s191_s7, 32 }
  0x49   : > { %175 = vst [vmem:[%s171_s17] sm:$0x3] %v174_v2  ;;  %p396_p9 = scmp.ne.s32.totalorder %s191_s7, %s395_s23  ;;  %p668_p11 = scmp.ne.s32.totalorder %s662_s29, 0 }
  0x4a   : > { %s467_s24 = smov [#allocation7]  }
  0x4b   : > { %p397_p13 = pnand %p396_p9, %p668_p11  ;;  %s399_s25 = sshll.u32 %s467_s24, 4  ;;  %s400_s25 = int_to_ptr.vmem [resolvable:$false] %s399_s25 }
  0x4c   : > { %s401_s26 = scalar_lea.vmem %s400_s25, 64  ;;  %p402_p1 = scmp.lt.s32.totalorder %s191_s7, %s400_s25 }
  0x4d   : > { %p398_p10 = pneg %p397_p13  ;;  %p403_p2 = scmp.lt.s32.totalorder %s401_s26, %s395_s23 }
  0x4f   : > { %p404_p0 = por %p403_p2, %p402_p1 }
  0x51   : > { %p405_p3 = pnand %p404_p0, %p398_p10 }
  0x53   : > { %408 = shalt.err (!%p405_p3)
}
  0x54   : > { %s409_s13 = scalar_lea.hbm %s188_s15, 32  ;;  %s413_s3 = scalar_lea.hbm %s651_s2, 64 }
  0x55   : > { %p410_p12 = scmp.ne.s32.totalorder %s188_s15, %s409_s13  ;;  %p414_p6 = scmp.lt.s32.totalorder %s188_s15, %s651_s2 }
  0x56   : > { %p415_p4 = scmp.lt.s32.totalorder %s413_s3, %s409_s13 }
  0x57   : > { %p411_p5 = pnand %p410_p12, %p668_p11 }
  0x58   : > { %p416_p8 = por %p415_p4, %p414_p6 }
  0x59   : > { %p412_p7 = pneg %p411_p5 }
  0x5b   : > { %p417_p9 = pnand %p416_p8, %p412_p7 }
  0x5d   : > { %420 = shalt.err (!%p417_p9)
}
  0x5e   : > { %290 = dma.vmem_to_hbm [thread:$0]  (%p668_p11), %s191_s7, 32, %s188_s15, %s177_s22  }
  0x5f PF: > { %s202_s6 = sand.u32 1, %s451_s9   ;;  %p669_p13 = scmp.ne.s32.totalorder %s657_s16, 0 }
  0x60   : > { %p670_p10 = scmp.ge.s32.totalorder %s463_s12, 2  ;;  %s203_s8 = scalar_lea.sflag [#allocation4], %s202_s6 }
  0x62   : > { %p301_p1 = pnand %p670_p10, %p669_p13 }
  0x64   : > { %p302_p2 = pneg %p301_p1 }
  0x66   : > { %446 = dma.done.wait (%p302_p2), %s203_s8, 32  }
  0x67   : > { %448 = vsyncadd (%p302_p2), %s203_s8, 4294967264  ;;  %p16_p0 = scmp.ge.s32.totalorder %s531_s20, 4   ;;  %s671_s9 = smov %s455_s10 }
  0x68   : > { %s672_s10 = smov %s459_s11  ;;  %s673_s11 = smov %s558_s28 }
  0x69   : > { %s674_s12 = smov %s531_s20  ;;  %18 = sbr.rel (!%p16_p0) target bundleno = 6 (0x6), region = 77 }
  0x6e   :  { %208 = vsyncpa [#allocation3], 1 }
  0x6f   :  { %210 = vsyncpa [#allocation3 + $0x1], 1 }
  0x70   :  { %211 = vsyncpa [#allocation6], 1 }
  0x71   :  { %212 = vsyncpa [#allocation4], 1 }
  0x72   :  { %214 = vsyncpa [#allocation4 + $0x1], 1 }

</bundles_post_ra>
